<compile_context>
chip_gen: v6e
topology: v6e:2x2x1
jax: 0.10.0
libtpu: 0.0.40
codegen_flags: <defaults>
</compile_context>

<pallas_src>
import jax
import jax.numpy as jnp
from jax.experimental import pallas as pl
from jax.experimental.pallas import tpu as pltpu


def _identity_kernel(x_ref, o_ref):
    # Pure pass-through: full-width (lane-dense) VMEM tile copy.
    o_ref[...] = x_ref[...]


_LANE_CANDIDATES = (8192, 4096, 2048, 1024, 512, 256, 128)


def _vmem_capacity_bytes() -> int:
    try:
        return int(pltpu.get_tpu_info().vmem_capacity_bytes)
    except Exception:
        return 64 << 20  # conservative (v7x-sized) fallback


def _choose_tile_rows(rows, lane, itemsize, block_bytes_target):
    """Row tile that divides `rows`, fits the VMEM block budget, and satisfies
    the (8, 128) tiling rule (multiple of 8 or full extent)."""
    row_bytes = lane * itemsize
    max_tile_rows = max(1, block_bytes_target // row_bytes)

    if rows <= max_tile_rows:
        tile_rows = rows  # full extent is always tiling-legal
    else:
        tile_rows = None
        for cand in range(min(max_tile_rows, rows), 0, -1):
            if rows % cand == 0 and cand % 8 == 0:
                tile_rows = cand
                break
        if tile_rows is None:
            return None

    # Prefer >= 2 grid steps so v7x's two TensorCores both get work
    # (free no-op on single-core v5e/v6e). Only split when both halves stay
    # multiples of 8 and the block is big enough to be worth a grid step.
    if tile_rows == rows and rows % 16 == 0 and tile_rows * row_bytes > (1 << 20):
        tile_rows = rows // 2
    return tile_rows


def _identity_impl(x: jax.Array) -> jax.Array:
    orig_shape = x.shape
    dtype = x.dtype
    n = x.size
    itemsize = jnp.dtype(dtype).itemsize

    if n == 0:
        return x

    # Lane-dense view: widest lane extent (multiple of 128) dividing n.
    lane = None
    for cand in _LANE_CANDIDATES:
        if n % cand == 0:
            lane = cand
            break
    if lane is None:
        # Ragged element count: Identity needs zero data movement; skip the
        # kernel rather than take a masked vst.msk / 4-byte-wide DMA path.
        return x

    rows = n // lane
    x2d = x.reshape(rows, lane)

    # VMEM-budget-driven block sizing: in + out, each double-buffered
    # (~4-5 live block copies). Derived from the chip's VMEM so the same code
    # path fits v5e/v6e (128 MiB) and v7x (64 MiB).
    vmem_cap = _vmem_capacity_bytes()
    kernel_budget = min(vmem_cap // 2, 48 << 20)
    block_bytes_target = min(8 << 20, max(1 << 20, kernel_budget // 5))

    tile_rows = _choose_tile_rows(rows, lane, itemsize, block_bytes_target)
    if tile_rows is None:
        # No (8,128)-friendly tiling within budget; Identity is free anyway.
        return x

    grid = (rows // tile_rows,)
    block_bytes = tile_rows * lane * itemsize
    vmem_limit = max(
        16 << 20,
        min(vmem_cap - (8 << 20), max(32 << 20, 5 * block_bytes)),
    )

    out2d = pl.pallas_call(
        _identity_kernel,
        out_shape=jax.ShapeDtypeStruct((rows, lane), dtype),
        grid_spec=pltpu.PrefetchScalarGridSpec(
            num_scalar_prefetch=0,
            grid=grid,
            in_specs=[pl.BlockSpec((tile_rows, lane), lambda i: (i, 0))],
            out_specs=pl.BlockSpec((tile_rows, lane), lambda i: (i, 0)),
        ),
        compiler_params=pltpu.CompilerParams(
            dimension_semantics=("parallel",),
            vmem_limit_bytes=int(vmem_limit),
        ),
        cost_estimate=pl.CostEstimate(
            flops=0,
            transcendentals=0,
            bytes_accessed=2 * n * itemsize,
        ),
        input_output_aliases={0: 0},
    )(x2d)

    return out2d.reshape(orig_shape)


@jax.jit
def identity(x: jax.Array) -> jax.Array:
    """Pallas implementation of nn.Identity.forward: returns x unchanged.

    Note: the zero-cost implementation of Identity is simply `return x`; the
    kernel path is kept for cases that require an explicit materialized
    HBM->HBM copy, and runs it at near-roofline bandwidth.
    """
    return _identity_impl(x)


if __name__ == "__main__":
    key = jax.random.PRNGKey(0)

    # Small NCHW example consistent with a conv-style SimCLR input.
    x = jax.random.normal(key, (2, 4, 16, 16), dtype=jnp.float32)
    y = identity(x)
    jax.block_until_ready(y)
    assert y.shape == x.shape and y.dtype == x.dtype
    assert bool(jnp.all(y == x))

    # Larger input: exercises lane-dense (8192-wide) tiling + multi-step grid.
    x2 = jax.random.normal(jax.random.PRNGKey(1), (8, 64, 32, 32), dtype=jnp.float32)
    y2 = identity(x2)
    jax.block_until_ready(y2)
    assert y2.shape == x2.shape and y2.dtype == x2.dtype
    assert bool(jnp.all(y2 == x2))

    # Ragged element count (not a multiple of 128): zero-copy fallback path.
    x3 = jax.random.normal(jax.random.PRNGKey(2), (3, 5, 7), dtype=jnp.float32)
    y3 = identity(x3)
    jax.block_until_ready(y3)
    assert y3.shape == x3.shape and y3.dtype == x3.dtype
    assert bool(jnp.all(y3 == x3))

    print("KERNEL_OK")
</pallas_src>

<mosaic_0001>
module attributes {stable_mosaic.version = 11 : i64} {
  func.func @_identity_kernel(%arg0: i32, %arg1: memref<1x2048xf32, #tpu.memory_space<vmem>>, %arg2: memref<1x2048xf32, #tpu.memory_space<vmem>>) attributes {dimension_semantics = [#tpu.dimension_semantics<parallel>], iteration_bounds = array<i64: 1>, scalar_prefetch = 0 : i64, scratch_operands = 0 : i64, tpu.core_type = #tpu.core_type<tc>, window_params = [{transform_indices = @transform_0, window_bounds = array<i64: 1, 2048>}, {transform_indices = @transform_1, window_bounds = array<i64: 1, 2048>}]} {
    %c0 = arith.constant 0 : index
    %c0_0 = arith.constant 0 : index
    %0 = vector.load %arg1[%c0, %c0_0] : memref<1x2048xf32, #tpu.memory_space<vmem>>, vector<1x2048xf32>
    %c0_1 = arith.constant 0 : index
    %c0_2 = arith.constant 0 : index
    %1 = vector.load %arg2[%c0_1, %c0_2] : memref<1x2048xf32, #tpu.memory_space<vmem>>, vector<1x2048xf32>
    tpu.vector_store %arg2[%c0_1, %c0_2], %0 {strides = array<i32>} : memref<1x2048xf32, #tpu.memory_space<vmem>>, vector<1x2048xf32>,
    return
  }
  func.func @transform_0(%arg0: i32) -> (i32, i32) {
    %c0_i32 = arith.constant 0 : i32
    %c0_i32_0 = arith.constant 0 : i32
    return %arg0, %c0_i32 : i32, i32
  }
  func.func @transform_1(%arg0: i32) -> (i32, i32) {
    %c0_i32 = arith.constant 0 : i32
    %c0_i32_0 = arith.constant 0 : i32
    return %arg0, %c0_i32 : i32, i32
  }
}

</mosaic_0001>

<bundles_post_ra>
// kernel: identity.1
= control target key start
LH: loop header
LB: loop body
LE: loop exit
PB: predicated region body
PF: predicated region fallthrough
CT: control target
= control target key end

     0   :  { %s38_s0 = inlined_call_operand.vmem [shape: f32[1,2048], index: 0, kind: input, shape index: {}, may-alias: {0,1}]   ;;  %s39_s1 = inlined_call_operand.vmem [shape: f32[1,2048], index: 1, kind: output, shape index: {}, may-alias: {0,1}]  }
   0x1   :  { %v8_v0 = vld [vmem:[%s38_s0] sm:$0xff]  ;;  %v9_v1 = vld [vmem:[%s38_s0 + $0x8] sm:$0xff] }
   0x2   :  { %10 = vst [vmem:[%s39_s1] sm:$0xff] %v8_v0  ;;  %11 = vst [vmem:[%s39_s1 + $0x8] sm:$0xff] %v9_v1 }

</bundles_post_ra>
